<compile_context>
chip_gen: v7x
topology: tpu7x:2x2x1
jax: 0.10.0
libtpu: 0.0.40
codegen_flags: <defaults>
</compile_context>

<pallas_src>
import jax
import jax.numpy as jnp
from jax.experimental import pallas as pl
from jax.experimental.pallas import tpu as pltpu

_LANE = 128            # lane width (last-dim alignment)
_SUBLANE = 8           # f32 sublane height (second-to-last dim alignment)
_MAX_SINGLE_TN = 512   # single N block up to this many lanes, else tile by 256
_TN = 256              # N tile: multiple of 256 fills the 256-wide MXU (v6e/v7x)
_MAX_SINGLE_TK = 2048  # single K slab up to this, else tile by 512
_TK = 512
_TILE_B_MAX = 256      # conservative default batch tile (fits v7x 64 MiB VMEM)
_VMEM_SOFT_BUDGET = 32 * 1024 * 1024   # per-kernel working-set target


def _round_up(x, m):
    return (x + m - 1) // m * m


def _logreg_kernel(x_ref, w_ref, b_ref, o_ref, acc_ref):
    """One (batch-tile, N-tile) output block; K (in_dim) is the innermost grid axis."""
    k = pl.program_id(2)

    @pl.when(k == 0)
    def _():
        acc_ref[...] = jnp.zeros_like(acc_ref)

    # bf16 x bf16 -> f32 accumulation on the MXU.
    acc_ref[...] += jnp.dot(x_ref[...], w_ref[...],
                            preferred_element_type=jnp.float32)

    @pl.when(k == pl.num_programs(2) - 1)
    def _():
        z = acc_ref[...] + b_ref[...]                  # (tile_b, tn) + (1, tn)
        # sigmoid(z) == 0.5*(tanh(z/2)+1): a single EUP push per element,
        # exact result; the mul/add ride the (4-wide) VALU slots.
        o_ref[...] = (0.5 * (jnp.tanh(0.5 * z) + 1.0)).astype(o_ref.dtype)


def prepare_logreg_params(w, b):
    """One-time repack of nn.Linear parameters for the kernel.

    Hoisted out of the forward path: the transpose + lane padding + bf16 cast
    of the weight matrix is a whole-array HBM round trip, so it is done once
    per parameter update, not once per call.
    """
    out_dim, in_dim = w.shape

    # N (output feature) tiling: lane-dense output; single block when small,
    # else 256-wide tiles.
    n128 = _round_up(out_dim, _LANE)
    if n128 <= _MAX_SINGLE_TN:
        n_pad, tn = n128, n128
    else:
        n_pad, tn = _round_up(out_dim, _TN), _TN

    # K (contraction) tiling: single slab when it fits comfortably in VMEM,
    # else 512-wide double-buffered K slabs.
    if in_dim <= _MAX_SINGLE_TK:
        k_pad, tk = in_dim, in_dim
    else:
        k_pad, tk = _round_up(in_dim, _TK), _TK

    w_t = jnp.pad(w.T, ((0, k_pad - in_dim), (0, n_pad - out_dim)))
    w_t = w_t.astype(jnp.bfloat16)                     # MXU-native bf16 rate
    b2d = jnp.pad(b.reshape(1, out_dim).astype(jnp.float32),
                  ((0, 0), (0, n_pad - out_dim)))

    return dict(w_t=w_t, b2d=b2d, in_dim=in_dim, out_dim=out_dim,
                k_pad=k_pad, tk=tk, n_pad=n_pad, tn=tn)


def logistic_regression_fwd(x, params):
    """y = sigmoid(x @ w.T + b) using pre-packed params from prepare_logreg_params."""
    B, in_dim = x.shape
    assert in_dim == params["in_dim"]
    out_dim = params["out_dim"]
    k_pad, tk = params["k_pad"], params["tk"]
    n_pad, tn = params["n_pad"], params["tn"]
    nk, nn = k_pad // tk, n_pad // tn

    # Weight / bias blocks are grid-constant when there is a single (K, N)
    # block -> single-buffer them (halves their VMEM footprint).
    w_bufs = 1 if (nk == 1 and nn == 1) else 2
    b_bufs = 1 if nn == 1 else 2

    # Batch tile from a conservative VMEM budget; cap at 256 and at ~B/2 so
    # the "parallel" batch axis keeps both v7x TensorCores busy.
    per_row = 2 * tk * 2 + 2 * tn * 4 + tn * 4        # x dbuf(bf16)+out dbuf(f32)+acc(f32)
    fixed = w_bufs * tk * tn * 2 + b_bufs * tn * 4
    tile_b_cap = min(_TILE_B_MAX,
                     max(_SUBLANE, (_VMEM_SOFT_BUDGET - fixed) // per_row))
    if B >= 2 * _SUBLANE:
        tile_b_cap = min(tile_b_cap, _round_up(pl.cdiv(B, 2), _SUBLANE))
    if B <= tile_b_cap:
        tile_b = B                                     # full-extent batch block
    else:
        tile_b = max(_SUBLANE, tile_b_cap // _SUBLANE * _SUBLANE)
    nb = pl.cdiv(B, tile_b)       # partial last block: OOB writes masked, no x pad

    # bf16 inputs: half the x read traffic, MXU-native rate. f32 accumulation.
    x_p = x.astype(jnp.bfloat16)
    if k_pad != in_dim:
        x_p = jnp.pad(x_p, ((0, 0), (0, k_pad - in_dim)))   # zero K padding

    # Explicit scoped-VMEM limit from the actual tile footprint (+ headroom),
    # kept well under v7x's 64 MiB physical VMEM.
    footprint = (2 * tile_b * tk * 2          # x, double-buffered, bf16
                 + w_bufs * tk * tn * 2       # weights
                 + b_bufs * tn * 4            # bias
                 + 2 * tile_b * tn * 4        # out, double-buffered, f32
                 + tile_b * tn * 4)           # f32 accumulator scratch
    vmem_limit = int(min(max(footprint * 3 // 2 + (4 << 20), 32 << 20), 48 << 20))

    cost = pl.CostEstimate(
        flops=2 * B * k_pad * n_pad,
        transcendentals=B * n_pad,            # one tanh per output element
        bytes_accessed=(2 * B * k_pad + 2 * k_pad * n_pad
                        + 4 * n_pad + 4 * B * n_pad),
    )

    def _build_and_call(use_single_buffer):
        def const_spec(shape, index_map, bufs):
            if use_single_buffer and bufs == 1:
                return pl.BlockSpec(shape, index_map,
                                    pipeline_mode=pl.Buffered(1))
            return pl.BlockSpec(shape, index_map)

        grid_spec = pltpu.PrefetchScalarGridSpec(
            num_scalar_prefetch=0,
            grid=(nb, nn, nk),                          # reduction (K) axis last
            in_specs=[
                pl.BlockSpec((tile_b, tk), lambda i, j, k: (i, k)),   # x tile
                const_spec((tk, tn), lambda i, j, k: (k, j), w_bufs),  # weights
                const_spec((1, tn), lambda i, j, k: (0, j), b_bufs),   # bias
            ],
            out_specs=pl.BlockSpec((tile_b, tn), lambda i, j, k: (i, j)),
            scratch_shapes=[pltpu.VMEM((tile_b, tn), jnp.float32)],
        )
        return pl.pallas_call(
            _logreg_kernel,
            out_shape=jax.ShapeDtypeStruct((B, n_pad), jnp.float32),
            grid_spec=grid_spec,
            compiler_params=pltpu.CompilerParams(
                dimension_semantics=("parallel", "parallel", "arbitrary"),
                vmem_limit_bytes=vmem_limit,
            ),
            cost_estimate=cost,
        )(x_p, params["w_t"], params["b2d"])

    try:
        out_padded = _build_and_call(use_single_buffer=True)
    except Exception:
        # Compatibility guard: if this jax build rejects pipeline_mode /
        # Buffered(1), fall back to default double-buffering (same math,
        # slightly more VMEM). Real kernel bugs still surface here.
        out_padded = _build_and_call(use_single_buffer=False)

    # Column slice only when out_dim is not lane-aligned; consumers that can
    # accept the lane-padded (B, n_pad) buffer should skip this copy.
    if n_pad != out_dim:
        out_padded = out_padded[:, :out_dim]
    return out_padded


def logistic_regression(x, w, b):
    """Convenience wrapper: y = sigmoid(x @ w.T + b), w/b in nn.Linear layout."""
    return logistic_regression_fwd(x, prepare_logreg_params(w, b))


if __name__ == "__main__":
    # Small shapes consistent with the module: input_dim=32, output_dim=16, batch=8.
    batch, input_dim, output_dim = 8, 32, 16

    key = jax.random.PRNGKey(0)
    kx, kw, kb = jax.random.split(key, 3)

    x = jax.random.normal(kx, (batch, input_dim), dtype=jnp.float32)
    # Deterministic init mimicking nn.Linear's uniform(-1/sqrt(in), 1/sqrt(in)).
    bound = 1.0 / jnp.sqrt(jnp.float32(input_dim))
    w = jax.random.uniform(kw, (output_dim, input_dim), jnp.float32, -bound, bound)
    b = jax.random.uniform(kb, (output_dim,), jnp.float32, -bound, bound)

    params = prepare_logreg_params(w, b)        # hoisted weight repack (done once)
    out = logistic_regression_fwd(x, params)
    jax.block_until_ready(out)

    # Cross-check against plain JAX f32 reference.
    ref = jax.nn.sigmoid(x @ w.T + b)
    assert out.shape == (batch, output_dim)
    # bf16 inputs give ~1e-3-level deviation vs the f32 reference.
    assert jnp.allclose(out, ref, atol=2e-2, rtol=2e-2)

    print("KERNEL_OK")
</pallas_src>

<mosaic_0001>
module attributes {stable_mosaic.version = 11 : i64} {
  func.func @_logreg_kernel(%arg0: i32, %arg1: i32, %arg2: i32, %arg3: memref<8x32xbf16, #tpu.memory_space<vmem>>, %arg4: memref<32x128xbf16, #tpu.memory_space<vmem>>, %arg5: memref<1x128xf32, #tpu.memory_space<vmem>>, %arg6: memref<8x128xf32, #tpu.memory_space<vmem>>, %arg7: memref<8x128xf32, #tpu.memory_space<vmem>>) attributes {dimension_semantics = [#tpu.dimension_semantics<parallel>, #tpu.dimension_semantics<parallel>, #tpu.dimension_semantics<arbitrary>], iteration_bounds = array<i64: 1, 1, 1>, scalar_prefetch = 0 : i64, scratch_operands = 1 : i64, tpu.core_type = #tpu.core_type<tc>, window_params = [{transform_indices = @transform_0, window_bounds = array<i64: 8, 32>}, {pipeline_mode = #tpu.pipeline_mode<synchronous>, transform_indices = @transform_1, window_bounds = array<i64: 32, 128>}, {pipeline_mode = #tpu.pipeline_mode<synchronous>, transform_indices = @transform_2, window_bounds = array<i64: 1, 128>}, {transform_indices = @transform_3, window_bounds = array<i64: 8, 128>}]} {
    %c0_i32 = arith.constant 0 : i32
    %0 = arith.cmpi eq, %arg2, %c0_i32 : i32
    %1 = arith.extui %0 : i1 to i32
    %c0_i32_0 = arith.constant 0 : i32
    %2 = arith.cmpi ne, %1, %c0_i32_0 : i32
    scf.if %2 {
      %cst_10 = arith.constant 0.000000e+00 : f32
      %12 = vector.broadcast %cst_10 : f32 to vector<8x128xf32>
      %c0_11 = arith.constant 0 : index
      %c0_12 = arith.constant 0 : index
      %13 = vector.load %arg7[%c0_11, %c0_12] : memref<8x128xf32, #tpu.memory_space<vmem>>, vector<8x128xf32>
      tpu.vector_store %arg7[%c0_11, %c0_12], %12 {strides = array<i32>} : memref<8x128xf32, #tpu.memory_space<vmem>>, vector<8x128xf32>,
    } else {
    }
    %c0 = arith.constant 0 : index
    %c0_1 = arith.constant 0 : index
    %3 = vector.load %arg7[%c0, %c0_1] : memref<8x128xf32, #tpu.memory_space<vmem>>, vector<8x128xf32>
    %c0_2 = arith.constant 0 : index
    %c0_3 = arith.constant 0 : index
    %4 = vector.load %arg3[%c0_2, %c0_3] : memref<8x32xbf16, #tpu.memory_space<vmem>>, vector<8x32xbf16>
    %c0_4 = arith.constant 0 : index
    %c0_5 = arith.constant 0 : index
    %5 = vector.load %arg4[%c0_4, %c0_5] : memref<32x128xbf16, #tpu.memory_space<vmem>>, vector<32x128xbf16>
    %cst = arith.constant dense<0.000000e+00> : vector<8x128xf32>
    %6 = tpu.matmul %4, %5, %cst {dimension_numbers = #tpu.dot_dimension_numbers<[1], [0], [0], [1], [0, 0, 1, 1], [], []>} : vector<8x32xbf16>, vector<32x128xbf16>, vector<8x128xf32> -> vector<8x128xf32>
    %7 = arith.addf %3, %6 : vector<8x128xf32>
    %c0_6 = arith.constant 0 : index
    %c0_7 = arith.constant 0 : index
    %8 = vector.load %arg7[%c0_6, %c0_7] : memref<8x128xf32, #tpu.memory_space<vmem>>, vector<8x128xf32>
    tpu.vector_store %arg7[%c0_6, %c0_7], %7 {strides = array<i32>} : memref<8x128xf32, #tpu.memory_space<vmem>>, vector<8x128xf32>,
    %c0_i32_8 = arith.constant 0 : i32
    %9 = arith.cmpi eq, %arg2, %c0_i32_8 : i32
    %10 = arith.extui %9 : i1 to i32
    %c0_i32_9 = arith.constant 0 : i32
    %11 = arith.cmpi ne, %10, %c0_i32_9 : i32
    scf.if %11 {
      %c0_10 = arith.constant 0 : index
      %c0_11 = arith.constant 0 : index
      %12 = vector.load %arg7[%c0_10, %c0_11] : memref<8x128xf32, #tpu.memory_space<vmem>>, vector<8x128xf32>
      %c0_12 = arith.constant 0 : index
      %c0_13 = arith.constant 0 : index
      %13 = vector.load %arg5[%c0_12, %c0_13] : memref<1x128xf32, #tpu.memory_space<vmem>>, vector<1x128xf32>
      %14 = vector.broadcast %13 : vector<1x128xf32> to vector<8x128xf32>
      %15 = arith.addf %12, %14 : vector<8x128xf32>
      %cst_14 = arith.constant 5.000000e-01 : f32
      %16 = vector.broadcast %cst_14 : f32 to vector<8x128xf32>
      %17 = arith.mulf %16, %15 : vector<8x128xf32>
      %18 = math.tanh %17 : vector<8x128xf32>
      %cst_15 = arith.constant 1.000000e+00 : f32
      %19 = vector.broadcast %cst_15 : f32 to vector<8x128xf32>
      %20 = arith.addf %18, %19 : vector<8x128xf32>
      %cst_16 = arith.constant 5.000000e-01 : f32
      %21 = vector.broadcast %cst_16 : f32 to vector<8x128xf32>
      %22 = arith.mulf %21, %20 : vector<8x128xf32>
      %c0_17 = arith.constant 0 : index
      %c0_18 = arith.constant 0 : index
      %23 = vector.load %arg6[%c0_17, %c0_18] : memref<8x128xf32, #tpu.memory_space<vmem>>, vector<8x128xf32>
      tpu.vector_store %arg6[%c0_17, %c0_18], %22 {strides = array<i32>} : memref<8x128xf32, #tpu.memory_space<vmem>>, vector<8x128xf32>,
    } else {
    }
    return
  }
  func.func @transform_0(%arg0: i32, %arg1: i32, %arg2: i32) -> (i32, i32) {
    %c0_i32 = arith.constant 0 : i32
    return %arg0, %arg2 : i32, i32
  }
  func.func @transform_1(%arg0: i32, %arg1: i32, %arg2: i32) -> (i32, i32) {
    %c0_i32 = arith.constant 0 : i32
    return %arg2, %arg1 : i32, i32
  }
  func.func @transform_2(%arg0: i32, %arg1: i32, %arg2: i32) -> (i32, i32) {
    %c0_i32 = arith.constant 0 : i32
    %c0_i32_0 = arith.constant 0 : i32
    return %c0_i32, %arg1 : i32, i32
  }
  func.func @transform_3(%arg0: i32, %arg1: i32, %arg2: i32) -> (i32, i32) {
    %c0_i32 = arith.constant 0 : i32
    return %arg0, %arg1 : i32, i32
  }
}

module attributes {stable_mosaic.version = 11 : i64} {
  func.func @_logreg_kernel(%arg0: i32, %arg1: i32, %arg2: i32, %arg3: memref<8x32xbf16, #tpu.memory_space<vmem>>, %arg4: memref<32x128xbf16, #tpu.memory_space<vmem>>, %arg5: memref<1x128xf32, #tpu.memory_space<vmem>>, %arg6: memref<8x128xf32, #tpu.memory_space<vmem>>, %arg7: memref<8x128xf32, #tpu.memory_space<vmem>>) attributes {dimension_semantics = [#tpu.dimension_semantics<parallel>, #tpu.dimension_semantics<parallel>, #tpu.dimension_semantics<arbitrary>], iteration_bounds = array<i64: 1, 1, 1>, scalar_prefetch = 0 : i64, scratch_operands = 1 : i64, tpu.core_type = #tpu.core_type<tc>, window_params = [{transform_indices = @transform_0, window_bounds = array<i64: 8, 32>}, {transform_indices = @transform_1, window_bounds = array<i64: 32, 128>}, {transform_indices = @transform_2, window_bounds = array<i64: 1, 128>}, {transform_indices = @transform_3, window_bounds = array<i64: 8, 128>}]} {
    %c0_i32 = arith.constant 0 : i32
    %0 = arith.cmpi eq, %arg2, %c0_i32 : i32
    %1 = arith.extui %0 : i1 to i32
    %c0_i32_0 = arith.constant 0 : i32
    %2 = arith.cmpi ne, %1, %c0_i32_0 : i32
    scf.if %2 {
      %cst_10 = arith.constant 0.000000e+00 : f32
      %12 = vector.broadcast %cst_10 : f32 to vector<8x128xf32>
      %c0_11 = arith.constant 0 : index
      %c0_12 = arith.constant 0 : index
      %13 = vector.load %arg7[%c0_11, %c0_12] : memref<8x128xf32, #tpu.memory_space<vmem>>, vector<8x128xf32>
      tpu.vector_store %arg7[%c0_11, %c0_12], %12 {strides = array<i32>} : memref<8x128xf32, #tpu.memory_space<vmem>>, vector<8x128xf32>,
    } else {
    }
    %c0 = arith.constant 0 : index
    %c0_1 = arith.constant 0 : index
    %3 = vector.load %arg7[%c0, %c0_1] : memref<8x128xf32, #tpu.memory_space<vmem>>, vector<8x128xf32>
    %c0_2 = arith.constant 0 : index
    %c0_3 = arith.constant 0 : index
    %4 = vector.load %arg3[%c0_2, %c0_3] : memref<8x32xbf16, #tpu.memory_space<vmem>>, vector<8x32xbf16>
    %c0_4 = arith.constant 0 : index
    %c0_5 = arith.constant 0 : index
    %5 = vector.load %arg4[%c0_4, %c0_5] : memref<32x128xbf16, #tpu.memory_space<vmem>>, vector<32x128xbf16>
    %cst = arith.constant dense<0.000000e+00> : vector<8x128xf32>
    %6 = tpu.matmul %4, %5, %cst {dimension_numbers = #tpu.dot_dimension_numbers<[1], [0], [0], [1], [0, 0, 1, 1], [], []>} : vector<8x32xbf16>, vector<32x128xbf16>, vector<8x128xf32> -> vector<8x128xf32>
    %7 = arith.addf %3, %6 : vector<8x128xf32>
    %c0_6 = arith.constant 0 : index
    %c0_7 = arith.constant 0 : index
    %8 = vector.load %arg7[%c0_6, %c0_7] : memref<8x128xf32, #tpu.memory_space<vmem>>, vector<8x128xf32>
    tpu.vector_store %arg7[%c0_6, %c0_7], %7 {strides = array<i32>} : memref<8x128xf32, #tpu.memory_space<vmem>>, vector<8x128xf32>,
    %c0_i32_8 = arith.constant 0 : i32
    %9 = arith.cmpi eq, %arg2, %c0_i32_8 : i32
    %10 = arith.extui %9 : i1 to i32
    %c0_i32_9 = arith.constant 0 : i32
    %11 = arith.cmpi ne, %10, %c0_i32_9 : i32
    scf.if %11 {
      %c0_10 = arith.constant 0 : index
      %c0_11 = arith.constant 0 : index
      %12 = vector.load %arg7[%c0_10, %c0_11] : memref<8x128xf32, #tpu.memory_space<vmem>>, vector<8x128xf32>
      %c0_12 = arith.constant 0 : index
      %c0_13 = arith.constant 0 : index
      %13 = vector.load %arg5[%c0_12, %c0_13] : memref<1x128xf32, #tpu.memory_space<vmem>>, vector<1x128xf32>
      %14 = vector.broadcast %13 : vector<1x128xf32> to vector<8x128xf32>
      %15 = arith.addf %12, %14 : vector<8x128xf32>
      %cst_14 = arith.constant 5.000000e-01 : f32
      %16 = vector.broadcast %cst_14 : f32 to vector<8x128xf32>
      %17 = arith.mulf %16, %15 : vector<8x128xf32>
      %18 = math.tanh %17 : vector<8x128xf32>
      %cst_15 = arith.constant 1.000000e+00 : f32
      %19 = vector.broadcast %cst_15 : f32 to vector<8x128xf32>
      %20 = arith.addf %18, %19 : vector<8x128xf32>
      %cst_16 = arith.constant 5.000000e-01 : f32
      %21 = vector.broadcast %cst_16 : f32 to vector<8x128xf32>
      %22 = arith.mulf %21, %20 : vector<8x128xf32>
      %c0_17 = arith.constant 0 : index
      %c0_18 = arith.constant 0 : index
      %23 = vector.load %arg6[%c0_17, %c0_18] : memref<8x128xf32, #tpu.memory_space<vmem>>, vector<8x128xf32>
      tpu.vector_store %arg6[%c0_17, %c0_18], %22 {strides = array<i32>} : memref<8x128xf32, #tpu.memory_space<vmem>>, vector<8x128xf32>,
    } else {
    }
    return
  }
  func.func @transform_0(%arg0: i32, %arg1: i32, %arg2: i32) -> (i32, i32) {
    %c0_i32 = arith.constant 0 : i32
    return %arg0, %arg2 : i32, i32
  }
  func.func @transform_1(%arg0: i32, %arg1: i32, %arg2: i32) -> (i32, i32) {
    %c0_i32 = arith.constant 0 : i32
    return %arg2, %arg1 : i32, i32
  }
  func.func @transform_2(%arg0: i32, %arg1: i32, %arg2: i32) -> (i32, i32) {
    %c0_i32 = arith.constant 0 : i32
    %c0_i32_0 = arith.constant 0 : i32
    return %c0_i32, %arg1 : i32, i32
  }
  func.func @transform_3(%arg0: i32, %arg1: i32, %arg2: i32) -> (i32, i32) {
    %c0_i32 = arith.constant 0 : i32
    return %arg0, %arg1 : i32, i32
  }
}

</mosaic_0001>

<bundles_post_ra>
// kernel: tpu_custom_call.1
= control target key start
LH: loop header
LB: loop body
LE: loop exit
PB: predicated region body
PF: predicated region fallthrough
CT: control target
= control target key end

     0   :  { %8 = vsyncpa [#allocation4], 0  ;;  %s315_s0 = inlined_call_operand.hbm [shape: bf16[8,32], index: 0, kind: input, shape index: {}]   ;;  %s316_s1 = inlined_call_operand.hbm [shape: bf16[32,128], index: 1, kind: input, shape index: {}]   ;;  %s317_s2 = inlined_call_operand.vmem [shape: f32[1,128], index: 2, kind: input, shape index: {}]   ;;  %s318_s3 = inlined_call_operand.hbm [shape: f32[8,128], index: 3, kind: output, shape index: {}]  }
   0x1   :  { %9 = vsyncpa [#allocation7], 0 }
   0x2   :  { %10 = vsyncpa [#allocation5], 0  ;;  %s242_s12 = smov [#allocation3]   ;;  %s243_s14 = smov [#allocation6]  }
   0x3   :  { %s17_s13 = sshll.u32 %s242_s12, 4  ;;  %s26_s15 = sshll.u32 %s243_s14, 4  ;;  %s18_s13 = int_to_ptr.vmem [resolvable:$true] %s17_s13  ;;  %s269_s15 = int_to_ptr.vmem [resolvable:$true] %s26_s15 }
   0x4   :  { %s170_s18 = scalar_lea.hbm %s315_s0, 64 }
   0x5   :  { %p171_p0 = scmp.ne.s32.totalorder %s315_s0, %s170_s18  ;;  %p174_p1 = scmp.lt.u32.totalorder %s170_s18, %s315_s0 }
   0x7   :  { %p176_p2 = pnand %p174_p1, %p171_p0 }
   0x9   :  { %179 = shalt.err (!%p176_p2)
}
   0xa   :  { %s180_s23 = scalar_lea.vmem %s18_s13, 64  ;;  %p185_p4 = scmp.lt.s32.totalorder %s18_s13, %s18_s13 }
   0xb   :  { %p181_p3 = scmp.ne.s32.totalorder %s18_s13, %s180_s23  ;;  %p186_p5 = scmp.lt.s32.totalorder %s180_s23, %s180_s23 }
   0xd   :  { %p187_p6 = por %p186_p5, %p185_p4 }
   0xf   :  { %p188_p7 = pnand %p187_p6, %p181_p3 }
  0x11   :  { %191 = shalt.err (!%p188_p7)
}
  0x12   :  { %20 = dma.hbm_to_vmem [thread:$0]  %s315_s0, 64, %s18_s13, [#allocation4]  }
  0x13   :  { %s192_s28 = scalar_lea.hbm %s316_s1, 256 }
  0x14   :  { %p193_p8 = scmp.ne.s32.totalorder %s316_s1, %s192_s28  ;;  %p196_p9 = scmp.lt.u32.totalorder %s192_s28, %s316_s1 }
  0x16   :  { %p198_p10 = pnand %p196_p9, %p193_p8 }
  0x18   :  { %201 = shalt.err (!%p198_p10)
}
  0x19   :  { %s202_s6 = scalar_lea.vmem %s269_s15, 256  ;;  %p207_p12 = scmp.lt.s32.totalorder %s269_s15, %s269_s15 }
  0x1a   :  { %p203_p11 = scmp.ne.s32.totalorder %s269_s15, %s202_s6  ;;  %p208_p13 = scmp.lt.s32.totalorder %s202_s6, %s202_s6 }
  0x1c   :  { %p209_p0 = por %p208_p13, %p207_p12 }
  0x1e   :  { %p210_p1 = pnand %p209_p0, %p203_p11 }
  0x20   :  { %213 = shalt.err (!%p210_p1)
}
  0x21   :  { %s244_s0 = smov 64   ;;  %s245_s7 = smov 4  }
  0x22   :  { %32 = dma.hbm_to_vmem [thread:$0]  %s316_s1, 256, %s269_s15, [#allocation7], %s244_s0, %s244_s0, %s245_s7  }
  0x23   :  { %236 = dma.done.wait [#allocation4], 64  }
  0x24   :  { %237 = vsyncadd [#allocation4], 4294967232 }
  0x25   :  { %238 = dma.done.wait [#allocation7], 256  }
  0x26   :  { %239 = vsyncadd [#allocation7], 4294967040  ;;  %v246_v0 = vmov 0.0   ;;  %vm247_vm0 = vmmov 0   ;;  %v166_v1 = vld [vmem:[#allocation6] sm:$0xff]   ;;  %v167_v2 = vld [vmem:[#allocation6 + $0x8] sm:$0xff]  }
  0x27   :  { %151 = vmatprep.subr.bf16.mxu0 %v246_v0  ;;  %155 = vmatprep.mubr.msk.bf16.mxu0 %vm247_vm0, %v246_v0  ;;  %v48_v3 = vld [vmem:[#allocation3] sm:$0xf]  ;;  %vm65_vm1 = vcmask 261120   ;;  %s248_s1 = smov [#allocation8]  }
  0x28   :  { %152 = vmatpush3.bf16.msra.mxu0 %v166_v1  ;;  %v147_v4 = vld [vmem:[%s317_s2] ss:$0 sm:$0xff]  ;;  %s134_s12 = sshll.u32 %s248_s1, 4  ;;  %s135_s12 = int_to_ptr.vmem [resolvable:$true] %s134_s12 }
  0x29   :  { %153 = vmatprep.subr.bf16.mxu0 %v246_v0  ;;  %s214_s13 = scalar_lea.vmem %s135_s12, 128  ;;  %p219_p3 = scmp.lt.s32.totalorder %s135_s12, %s135_s12 }
  0x2a   :  { %p215_p2 = scmp.ne.s32.totalorder %s135_s12, %s214_s13  ;;  %p220_p4 = scmp.lt.s32.totalorder %s214_s13, %s214_s13 }
  0x2c   :  { %154 = vmatpush3.bf16.msra.mxu0 %v167_v2  ;;  %p221_p5 = por %p220_p4, %p219_p3 }
  0x2e   :  { %p222_p6 = pnand %p221_p5, %p215_p2 }
  0x2f   :  { %156 = vmatmul.mubr.msk.bf16.vlgmr.msra.gmra.mrb[0].mxu0 %vm65_vm1, %v48_v3 }
 0x102   :  { %v103_v5 = vpop.f32.mrb[0].mxu0 }
 0x103   :  { %v122_v6 = vadd.f32 %v147_v4, %v103_v5  ;;  %v157_v7 = vpop.f32.mrb[1].mxu0 }
 0x104   :  { %v106_v8 = vpop.f32.mrb[2].mxu0 }
 0x105   :  { %v123_v9 = vmul.f32 0.5, %v122_v6  ;;  %v158_v10 = vpop.f32.mrb[3].mxu0 }
 0x107   :  { %168 = vtanh.f32 %v123_v9 }
 0x111   :  { %v169_v11 = vpop.eup %168 }
 0x112   :  { %v125_v12 = vadd.f32 1.0, %v169_v11 }
 0x114   :  { %v126_v13 = vmul.f32 0.5, %v125_v12 }
 0x116   :  { %127 = vst [vmem:[#allocation8] sm:$0xff] %v126_v13 }
 0x117   :  { %225 = shalt.err (!%p222_p6)
}
 0x118   :  { %s226_s15 = scalar_lea.hbm %s318_s3, 128 }
 0x119   :  { %p227_p7 = scmp.ne.s32.totalorder %s318_s3, %s226_s15  ;;  %p230_p8 = scmp.lt.u32.totalorder %s226_s15, %s318_s3 }
 0x11b   :  { %p232_p9 = pnand %p230_p8, %p227_p7 }
 0x11d   :  { %235 = shalt.err (!%p232_p9)
}
 0x11e   :  { %137 = dma.vmem_to_hbm [thread:$0]  %s135_s12, 128, %s318_s3, [#allocation5]  }
 0x11f   :  { %240 = dma.done.wait [#allocation5], 128  }
 0x120   :  { %241 = vsyncadd [#allocation5], 4294967168 }
 0x121   :  { %141 = vsyncpa [#allocation4], 1 }
 0x122   :  { %142 = vsyncpa [#allocation7], 1 }
 0x123   :  { %143 = vsyncpa [#allocation5], 1 }

// kernel: tpu_custom_call.1
= control target key start
LH: loop header
LB: loop body
LE: loop exit
PB: predicated region body
PF: predicated region fallthrough
CT: control target
= control target key end

     0   :  { %8 = vsyncpa [#allocation4], 0  ;;  %s315_s0 = inlined_call_operand.hbm [shape: bf16[8,32], index: 0, kind: input, shape index: {}]   ;;  %s316_s1 = inlined_call_operand.hbm [shape: bf16[32,128], index: 1, kind: input, shape index: {}]   ;;  %s317_s2 = inlined_call_operand.vmem [shape: f32[1,128], index: 2, kind: input, shape index: {}]   ;;  %s318_s3 = inlined_call_operand.hbm [shape: f32[8,128], index: 3, kind: output, shape index: {}]  }
   0x1   :  { %9 = vsyncpa [#allocation7], 0 }
   0x2   :  { %10 = vsyncpa [#allocation5], 0  ;;  %s242_s12 = smov [#allocation3]   ;;  %s243_s14 = smov [#allocation6]  }
   0x3   :  { %s17_s13 = sshll.u32 %s242_s12, 4  ;;  %s26_s15 = sshll.u32 %s243_s14, 4  ;;  %s18_s13 = int_to_ptr.vmem [resolvable:$true] %s17_s13  ;;  %s269_s15 = int_to_ptr.vmem [resolvable:$true] %s26_s15 }
   0x4   :  { %s170_s18 = scalar_lea.hbm %s315_s0, 64 }
   0x5   :  { %p171_p0 = scmp.ne.s32.totalorder %s315_s0, %s170_s18  ;;  %p174_p1 = scmp.lt.u32.totalorder %s170_s18, %s315_s0 }
   0x7   :  { %p176_p2 = pnand %p174_p1, %p171_p0 }
   0x9   :  { %179 = shalt.err (!%p176_p2)
}
   0xa   :  { %s180_s23 = scalar_lea.vmem %s18_s13, 64  ;;  %p185_p4 = scmp.lt.s32.totalorder %s18_s13, %s18_s13 }
   0xb   :  { %p181_p3 = scmp.ne.s32.totalorder %s18_s13, %s180_s23  ;;  %p186_p5 = scmp.lt.s32.totalorder %s180_s23, %s180_s23 }
   0xd   :  { %p187_p6 = por %p186_p5, %p185_p4 }
   0xf   :  { %p188_p7 = pnand %p187_p6, %p181_p3 }
  0x11   :  { %191 = shalt.err (!%p188_p7)
}
  0x12   :  { %20 = dma.hbm_to_vmem [thread:$0]  %s315_s0, 64, %s18_s13, [#allocation4]  }
  0x13   :  { %s192_s28 = scalar_lea.hbm %s316_s1, 256 }
  0x14   :  { %p193_p8 = scmp.ne.s32.totalorder %s316_s1, %s192_s28  ;;  %p196_p9 = scmp.lt.u32.totalorder %s192_s28, %s316_s1 }
  0x16   :  { %p198_p10 = pnand %p196_p9, %p193_p8 }
  0x18   :  { %201 = shalt.err (!%p198_p10)
}
  0x19   :  { %s202_s6 = scalar_lea.vmem %s269_s15, 256  ;;  %p207_p12 = scmp.lt.s32.totalorder %s269_s15, %s269_s15 }
  0x1a   :  { %p203_p11 = scmp.ne.s32.totalorder %s269_s15, %s202_s6  ;;  %p208_p13 = scmp.lt.s32.totalorder %s202_s6, %s202_s6 }
  0x1c   :  { %p209_p0 = por %p208_p13, %p207_p12 }
  0x1e   :  { %p210_p1 = pnand %p209_p0, %p203_p11 }
  0x20   :  { %213 = shalt.err (!%p210_p1)
}
  0x21   :  { %s244_s0 = smov 64   ;;  %s245_s7 = smov 4  }
  0x22   :  { %32 = dma.hbm_to_vmem [thread:$0]  %s316_s1, 256, %s269_s15, [#allocation7], %s244_s0, %s244_s0, %s245_s7  }
  0x23   :  { %236 = dma.done.wait [#allocation4], 64  }
  0x24   :  { %237 = vsyncadd [#allocation4], 4294967232 }
  0x25   :  { %238 = dma.done.wait [#allocation7], 256  }
  0x26   :  { %239 = vsyncadd [#allocation7], 4294967040  ;;  %v246_v0 = vmov 0.0   ;;  %vm247_vm0 = vmmov 0   ;;  %v166_v1 = vld [vmem:[#allocation6] sm:$0xff]   ;;  %v167_v2 = vld [vmem:[#allocation6 + $0x8] sm:$0xff]  }
  0x27   :  { %151 = vmatprep.subr.bf16.mxu0 %v246_v0  ;;  %155 = vmatprep.mubr.msk.bf16.mxu0 %vm247_vm0, %v246_v0  ;;  %v48_v3 = vld [vmem:[#allocation3] sm:$0xf]  ;;  %vm65_vm1 = vcmask 261120   ;;  %s248_s1 = smov [#allocation8]  }
  0x28   :  { %152 = vmatpush3.bf16.msra.mxu0 %v166_v1  ;;  %v147_v4 = vld [vmem:[%s317_s2] ss:$0 sm:$0xff]  ;;  %s134_s12 = sshll.u32 %s248_s1, 4  ;;  %s135_s12 = int_to_ptr.vmem [resolvable:$true] %s134_s12 }
  0x29   :  { %153 = vmatprep.subr.bf16.mxu0 %v246_v0  ;;  %s214_s13 = scalar_lea.vmem %s135_s12, 128  ;;  %p219_p3 = scmp.lt.s32.totalorder %s135_s12, %s135_s12 }
  0x2a   :  { %p215_p2 = scmp.ne.s32.totalorder %s135_s12, %s214_s13  ;;  %p220_p4 = scmp.lt.s32.totalorder %s214_s13, %s214_s13 }
  0x2c   :  { %154 = vmatpush3.bf16.msra.mxu0 %v167_v2  ;;  %p221_p5 = por %p220_p4, %p219_p3 }
  0x2e   :  { %p222_p6 = pnand %p221_p5, %p215_p2 }
  0x2f   :  { %156 = vmatmul.mubr.msk.bf16.vlgmr.msra.gmra.mrb[0].mxu0 %vm65_vm1, %v48_v3 }
 0x102   :  { %v103_v5 = vpop.f32.mrb[0].mxu0 }
 0x103   :  { %v122_v6 = vadd.f32 %v147_v4, %v103_v5  ;;  %v157_v7 = vpop.f32.mrb[1].mxu0 }
 0x104   :  { %v106_v8 = vpop.f32.mrb[2].mxu0 }
 0x105   :  { %v123_v9 = vmul.f32 0.5, %v122_v6  ;;  %v158_v10 = vpop.f32.mrb[3].mxu0 }
 0x107   :  { %168 = vtanh.f32 %v123_v9 }
 0x111   :  { %v169_v11 = vpop.eup %168 }
 0x112   :  { %v125_v12 = vadd.f32 1.0, %v169_v11 }
 0x114   :  { %v126_v13 = vmul.f32 0.5, %v125_v12 }
 0x116   :  { %127 = vst [vmem:[#allocation8] sm:$0xff] %v126_v13 }
 0x117   :  { %225 = shalt.err (!%p222_p6)
}
 0x118   :  { %s226_s15 = scalar_lea.hbm %s318_s3, 128 }
 0x119   :  { %p227_p7 = scmp.ne.s32.totalorder %s318_s3, %s226_s15  ;;  %p230_p8 = scmp.lt.u32.totalorder %s226_s15, %s318_s3 }
 0x11b   :  { %p232_p9 = pnand %p230_p8, %p227_p7 }
 0x11d   :  { %235 = shalt.err (!%p232_p9)
}
 0x11e   :  { %137 = dma.vmem_to_hbm [thread:$0]  %s135_s12, 128, %s318_s3, [#allocation5]  }
 0x11f   :  { %240 = dma.done.wait [#allocation5], 128  }
 0x120   :  { %241 = vsyncadd [#allocation5], 4294967168 }
 0x121   :  { %141 = vsyncpa [#allocation4], 1 }
 0x122   :  { %142 = vsyncpa [#allocation7], 1 }
 0x123   :  { %143 = vsyncpa [#allocation5], 1 }

</bundles_post_ra>
